<compile_context>
chip_gen: v7x
topology: tpu7x:2x2x1
jax: 0.10.0
libtpu: 0.0.40
codegen_flags: <defaults>
</compile_context>

<pallas_src>
import jax
import jax.numpy as jnp
from jax.experimental import pallas as pl
from jax.experimental.pallas import tpu as pltpu


def mlp_kernel(x_ref, w1_ref, b1_ref, w2_ref, b2_ref, w3_ref, b3_ref, o_ref):
    # Layer 1: Linear(F -> 32) + ReLU.
    # Contract F of both operands: (32, F) x (bm, F) -> (32, bm).  The (bm, F)
    # block is a contiguous DMA; its transposition happens on-chip.
    h1 = jax.lax.dot_general(
        w1_ref[...], x_ref[...], (((1,), (1,)), ((), ())),
        preferred_element_type=jnp.float32)
    h1 = jnp.maximum(h1 + b1_ref[...], 0.0)                 # (32,1) bias lane-broadcast

    # Layer 2: Linear(32 -> 8) + ReLU.   (8, 32) @ (32, bm) -> (8, bm).
    h2 = jnp.dot(w2_ref[...], h1, preferred_element_type=jnp.float32)
    h2 = jnp.maximum(h2 + b2_ref[...], 0.0)

    # Layer 3: Linear(8 -> 1) + Sigmoid on the VPU/XLU (no MXU round-trip):
    # broadcast-multiply by the (8, 1) weight column, reduce over 8 sublanes.
    h3 = jnp.sum(w3_ref[...] * h2, axis=0, keepdims=True)   # (1, bm), lane-dense
    h3 = h3 + b3_ref[0, 0]                                  # scalar bias from SMEM
    o_ref[...] = jax.nn.sigmoid(h3).astype(o_ref.dtype)


def _num_tensorcores():
    """TensorCores per chip (v7x: 2, v5e/v6e: 1), with safe fallbacks."""
    try:
        info = pltpu.get_tpu_info()
        for attr in ("num_cores", "core_count", "tensorcores_per_chip"):
            n = getattr(info, attr, None)
            if isinstance(n, int) and 1 <= n <= 8:
                return n
    except Exception:
        pass
    try:
        kind = jax.devices()[0].device_kind.lower()
        if "v7" in kind or "7x" in kind:
            return 2
    except Exception:
        pass
    return 1


def _choose_tiling(B, F, num_cores):
    """Pick (padded_batch, batch_tile) along the batch (grid) axis.

    Goals:
      * ~1-2 MiB of x per grid step so HBM DMA time dominates the ~0.35 us
        fixed per-step overhead.
      * VMEM cap as a function of F: x tile x2 buffers + (32,bm)/(8,bm)
        intermediates (+ temps) + sublane-padded (1,bm) output x2 buffers,
        kept under ~24 MiB (headroom below the 32 MiB scoped default, and
        safely inside v7x's 64 MiB physical VMEM).
      * 1-TC chips: single full-batch tile when it fits (fewest grid steps).
        Multi-TC chips: >=2 steps per TensorCore when B allows.
    """
    LANE = 128
    BYTES = 4
    # Per-lane VMEM bytes: x (F, x2 bufs) + transposed-x temp (F) + h1/h2 and
    # one temp each (2*32 + 2*8) + output padded to 8 sublanes (x2 bufs) + slack.
    per_lane = BYTES * (3 * F + 2 * 32 + 2 * 8 + 2 * 8) + 64
    vmem_budget = 24 << 20
    bm_cap = min((2 << 20) // (F * BYTES),      # ~2 MiB of input per step
                 vmem_budget // per_lane)
    bm_cap = max(LANE, (bm_cap // LANE) * LANE)

    Bp_lane = pl.cdiv(B, LANE) * LANE           # lane-aligned batch

    if num_cores <= 1:
        # Single TensorCore: one full-batch tile when it fits.
        if Bp_lane <= bm_cap:
            return Bp_lane, Bp_lane
        bm = bm_cap
    else:
        # Multi-TC: aim for >=2 steps per core, without dropping below 128 lanes.
        want_steps = 2 * num_cores
        bm = min(bm_cap, max(LANE, (Bp_lane // want_steps // LANE) * LANE))

    Bp = pl.cdiv(B, bm) * bm
    return Bp, bm


def mynet_forward(x, params):
    """x: (B, F) float32.  params: PyTorch-layout weights (see init_params)."""
    B, F = x.shape
    W1, b1 = params["W1"], params["b1"]   # (32, F), (32, 1)
    W2, b2 = params["W2"], params["b2"]   # (8, 32), (8, 1)
    W3, b3 = params["W3"], params["b3"]   # (8, 1),  (1, 1)

    Bp, bm = _choose_tiling(B, F, _num_tensorcores())

    # Ragged batch: pad rows of the untransposed (B, F) array (cheap, contiguous).
    if Bp != B:
        x = jnp.pad(x, ((0, Bp - B), (0, 0)))

    grid = (Bp // bm,)
    const = lambda i: (0, 0)                  # grid-invariant weight/bias blocks

    out = pl.pallas_call(
        mlp_kernel,
        out_shape=jax.ShapeDtypeStruct((1, Bp), jnp.float32),
        grid_spec=pltpu.PrefetchScalarGridSpec(
            num_scalar_prefetch=0,
            grid=grid,
            in_specs=[
                pl.BlockSpec((bm, F), lambda i: (i, 0)),   # native-layout x tile
                pl.BlockSpec(W1.shape, const),
                pl.BlockSpec(b1.shape, const),
                pl.BlockSpec(W2.shape, const),
                pl.BlockSpec(b2.shape, const),
                pl.BlockSpec(W3.shape, const),
                # true scalar bias -> SMEM, not a (1,1) VMEM tile
                pl.BlockSpec(memory_space=pltpu.MemorySpace.SMEM),
            ],
            out_specs=pl.BlockSpec((1, bm), lambda i: (0, i)),  # lane-dense output
        ),
        compiler_params=pltpu.CompilerParams(
            dimension_semantics=("parallel",)),
    )(x, W1, b1, W2, b2, W3, b3)

    return out[0, :B].reshape(B, 1)           # back to PyTorch's (B, 1)


def init_params(key, input_features):
    """nn.Linear-style init (uniform +/- 1/sqrt(fan_in)), PyTorch (out, in) layout."""
    def linear(key, fan_in, fan_out):
        kw, kb = jax.random.split(key)
        bound = 1.0 / jnp.sqrt(float(fan_in))
        W = jax.random.uniform(kw, (fan_out, fan_in), jnp.float32, -bound, bound)
        b = jax.random.uniform(kb, (fan_out, 1), jnp.float32, -bound, bound)
        return W, b

    k1, k2, k3 = jax.random.split(key, 3)
    W1, b1 = linear(k1, input_features, 32)   # (32, F), (32, 1)
    W2, b2 = linear(k2, 32, 8)                # (8, 32), (8, 1)
    W3, b3 = linear(k3, 8, 1)                 # (1, 8),  (1, 1)
    return {"W1": W1, "b1": b1, "W2": W2, "b2": b2,
            "W3": W3.T, "b3": b3}             # W3 stored as an (8, 1) column


def mynet_ref(x, p):
    """Pure-JAX reference of the PyTorch forward."""
    h = jnp.maximum(x @ p["W1"].T + p["b1"].T, 0.0)
    h = jnp.maximum(h @ p["W2"].T + p["b2"].T, 0.0)
    return jax.nn.sigmoid(h @ p["W3"] + p["b3"])


if __name__ == "__main__":
    key = jax.random.PRNGKey(0)
    kx, kp = jax.random.split(key)

    B = 256                 # small demo batch
    INPUT_FEATURES = 8      # occupancy-detection style sensor features

    x = jax.random.normal(kx, (B, INPUT_FEATURES), jnp.float32)
    params = init_params(kp, INPUT_FEATURES)

    out = jax.block_until_ready(mynet_forward(x, params))
    ref = mynet_ref(x, params)

    assert out.shape == (B, 1), out.shape
    assert jnp.allclose(out, ref, atol=1e-5, rtol=1e-5), "mismatch vs reference"

    print("KERNEL_OK")
</pallas_src>

<mosaic_0001>
module attributes {stable_mosaic.version = 11 : i64} {
  func.func @mlp_kernel(%arg0: i32, %arg1: memref<256x8xf32, #tpu.memory_space<vmem>>, %arg2: memref<32x8xf32, #tpu.memory_space<vmem>>, %arg3: memref<32x1xf32, #tpu.memory_space<vmem>>, %arg4: memref<8x32xf32, #tpu.memory_space<vmem>>, %arg5: memref<8x1xf32, #tpu.memory_space<vmem>>, %arg6: memref<8x1xf32, #tpu.memory_space<vmem>>, %arg7: memref<1x1xf32, #tpu.memory_space<smem>>, %arg8: memref<1x256xf32, #tpu.memory_space<vmem>>) attributes {dimension_semantics = [#tpu.dimension_semantics<parallel>], iteration_bounds = array<i64: 1>, scalar_prefetch = 0 : i64, scratch_operands = 0 : i64, tpu.core_type = #tpu.core_type<tc>, window_params = [{transform_indices = @transform_0, window_bounds = array<i64: 256, 8>}, {pipeline_mode = #tpu.pipeline_mode<synchronous>, transform_indices = @transform_1, window_bounds = array<i64: 32, 8>}, {pipeline_mode = #tpu.pipeline_mode<synchronous>, transform_indices = @transform_2, window_bounds = array<i64: 32, 1>}, {pipeline_mode = #tpu.pipeline_mode<synchronous>, transform_indices = @transform_3, window_bounds = array<i64: 8, 32>}, {pipeline_mode = #tpu.pipeline_mode<synchronous>, transform_indices = @transform_4, window_bounds = array<i64: 8, 1>}, {pipeline_mode = #tpu.pipeline_mode<synchronous>, transform_indices = @transform_5, window_bounds = array<i64: 8, 1>}, {transform_indices = @transform_6, window_bounds = array<i64: 1, 1>}, {transform_indices = @transform_7, window_bounds = array<i64: 1, 256>}]} {
    %c0 = arith.constant 0 : index
    %c0_0 = arith.constant 0 : index
    %0 = vector.load %arg2[%c0, %c0_0] : memref<32x8xf32, #tpu.memory_space<vmem>>, vector<32x8xf32>
    %c0_1 = arith.constant 0 : index
    %c0_2 = arith.constant 0 : index
    %1 = vector.load %arg1[%c0_1, %c0_2] : memref<256x8xf32, #tpu.memory_space<vmem>>, vector<256x8xf32>
    %cst = arith.constant dense<0.000000e+00> : vector<32x256xf32>
    %2 = tpu.matmul %0, %1, %cst {dimension_numbers = #tpu.dot_dimension_numbers<[1], [1], [0], [0], [0, 0, 1, 0], [], []>} : vector<32x8xf32>, vector<256x8xf32>, vector<32x256xf32> -> vector<32x256xf32>
    %c0_3 = arith.constant 0 : index
    %c0_4 = arith.constant 0 : index
    %3 = vector.load %arg3[%c0_3, %c0_4] : memref<32x1xf32, #tpu.memory_space<vmem>>, vector<32x1xf32>
    %4 = vector.broadcast %3 : vector<32x1xf32> to vector<32x256xf32>
    %5 = arith.addf %2, %4 : vector<32x256xf32>
    %cst_5 = arith.constant 0.000000e+00 : f32
    %6 = vector.broadcast %cst_5 : f32 to vector<32x256xf32>
    %7 = arith.maximumf %5, %6 : vector<32x256xf32>
    %c0_6 = arith.constant 0 : index
    %c0_7 = arith.constant 0 : index
    %8 = vector.load %arg4[%c0_6, %c0_7] : memref<8x32xf32, #tpu.memory_space<vmem>>, vector<8x32xf32>
    %cst_8 = arith.constant dense<0.000000e+00> : vector<8x256xf32>
    %9 = tpu.matmul %8, %7, %cst_8 {dimension_numbers = #tpu.dot_dimension_numbers<[1], [0], [0], [1], [0, 0, 1, 1], [], []>} : vector<8x32xf32>, vector<32x256xf32>, vector<8x256xf32> -> vector<8x256xf32>
    %c0_9 = arith.constant 0 : index
    %c0_10 = arith.constant 0 : index
    %10 = vector.load %arg5[%c0_9, %c0_10] : memref<8x1xf32, #tpu.memory_space<vmem>>, vector<8x1xf32>
    %11 = vector.broadcast %10 : vector<8x1xf32> to vector<8x256xf32>
    %12 = arith.addf %9, %11 : vector<8x256xf32>
    %cst_11 = arith.constant 0.000000e+00 : f32
    %13 = vector.broadcast %cst_11 : f32 to vector<8x256xf32>
    %14 = arith.maximumf %12, %13 : vector<8x256xf32>
    %c0_12 = arith.constant 0 : index
    %c0_13 = arith.constant 0 : index
    %15 = vector.load %arg6[%c0_12, %c0_13] : memref<8x1xf32, #tpu.memory_space<vmem>>, vector<8x1xf32>
    %16 = vector.broadcast %15 : vector<8x1xf32> to vector<8x256xf32>
    %17 = arith.mulf %16, %14 : vector<8x256xf32>
    %cst_14 = arith.constant dense<0.000000e+00> : vector<256xf32>
    %18 = vector.multi_reduction <add>, %17, %cst_14 [0] : vector<8x256xf32> to vector<256xf32>
    %19 = vector.shape_cast %18 : vector<256xf32> to vector<1x256xf32>
    %c0_15 = arith.constant 0 : index
    %c0_16 = arith.constant 0 : index
    %20 = memref.load %arg7[%c0_15, %c0_16] : memref<1x1xf32, #tpu.memory_space<smem>>
    %21 = vector.broadcast %20 : f32 to vector<1x256xf32>
    %22 = arith.addf %19, %21 : vector<1x256xf32>
    %23 = arith.negf %22 : vector<1x256xf32>
    %24 = math.exp %23 : vector<1x256xf32>
    %cst_17 = arith.constant 1.000000e+00 : f32
    %25 = vector.broadcast %cst_17 : f32 to vector<1x256xf32>
    %26 = arith.addf %25, %24 : vector<1x256xf32>
    %27 = arith.divf %25, %26 : vector<1x256xf32>
    %c0_18 = arith.constant 0 : index
    %c0_19 = arith.constant 0 : index
    %28 = vector.load %arg8[%c0_18, %c0_19] : memref<1x256xf32, #tpu.memory_space<vmem>>, vector<1x256xf32>
    tpu.vector_store %arg8[%c0_18, %c0_19], %27 {strides = array<i32>} : memref<1x256xf32, #tpu.memory_space<vmem>>, vector<1x256xf32>,
    return
  }
  func.func @transform_0(%arg0: i32) -> (i32, i32) {
    %c0_i32 = arith.constant 0 : i32
    %c0_i32_0 = arith.constant 0 : i32
    return %arg0, %c0_i32 : i32, i32
  }
  func.func @transform_1(%arg0: i32) -> (i32, i32) {
    %c0_i32 = arith.constant 0 : i32
    %c0_i32_0 = arith.constant 0 : i32
    %c0_i32_1 = arith.constant 0 : i32
    return %c0_i32, %c0_i32_0 : i32, i32
  }
  func.func @transform_2(%arg0: i32) -> (i32, i32) {
    %c0_i32 = arith.constant 0 : i32
    %c0_i32_0 = arith.constant 0 : i32
    %c0_i32_1 = arith.constant 0 : i32
    return %c0_i32, %c0_i32_0 : i32, i32
  }
  func.func @transform_3(%arg0: i32) -> (i32, i32) {
    %c0_i32 = arith.constant 0 : i32
    %c0_i32_0 = arith.constant 0 : i32
    %c0_i32_1 = arith.constant 0 : i32
    return %c0_i32, %c0_i32_0 : i32, i32
  }
  func.func @transform_4(%arg0: i32) -> (i32, i32) {
    %c0_i32 = arith.constant 0 : i32
    %c0_i32_0 = arith.constant 0 : i32
    %c0_i32_1 = arith.constant 0 : i32
    return %c0_i32, %c0_i32_0 : i32, i32
  }
  func.func @transform_5(%arg0: i32) -> (i32, i32) {
    %c0_i32 = arith.constant 0 : i32
    %c0_i32_0 = arith.constant 0 : i32
    %c0_i32_1 = arith.constant 0 : i32
    return %c0_i32, %c0_i32_0 : i32, i32
  }
  func.func @transform_6(%arg0: i32) -> (i32, i32) {
    %c0_i32 = arith.constant 0 : i32
    %c0_i32_0 = arith.constant 0 : i32
    %c0_i32_1 = arith.constant 0 : i32
    return %c0_i32, %c0_i32_0 : i32, i32
  }
  func.func @transform_7(%arg0: i32) -> (i32, i32) {
    %c0_i32 = arith.constant 0 : i32
    %c0_i32_0 = arith.constant 0 : i32
    return %c0_i32, %arg0 : i32, i32
  }
}

</mosaic_0001>

<bundles_post_ra>
// kernel: tpu_custom_call.1
= control target key start
LH: loop header
LB: loop body
LE: loop exit
PB: predicated region body
PF: predicated region fallthrough
CT: control target
= control target key end

     0   :  { %vm88_vm0 = vcmask 64512   ;;  %v624_v7 = vmov 0   ;;  %s858_s0 = inlined_call_operand.vmem [shape: f32[256,8], index: 0, kind: input, shape index: {}]   ;;  %s859_s1 = inlined_call_operand.vmem [shape: f32[32,8], index: 1, kind: input, shape index: {}]   ;;  %s860_s2 = inlined_call_operand.vmem [shape: f32[32,1], index: 2, kind: input, shape index: {}]   ;;  %s861_s3 = inlined_call_operand.vmem [shape: f32[8,32], index: 3, kind: input, shape index: {}]   ;;  %s862_s4 = inlined_call_operand.vmem [shape: f32[8,1], index: 4, kind: input, shape index: {}]   ;;  %s863_s5 = inlined_call_operand.vmem [shape: f32[8,1], index: 5, kind: input, shape index: {}]   ;;  %s864_s6 = inlined_call_operand.<no memory space> [shape: f32[1,1], index: 6, kind: input, shape index: {}]   ;;  %s865_s7 = inlined_call_operand.hbm [shape: f32[1,256], index: 7, kind: output, shape index: {}]  }
   0x1   :  { %v48_v0 = vld [vmem:[%s858_s0 + $0x80] sm:$0xff]  ;;  %v49_v1 = vld [vmem:[%s858_s0 + $0x88] sm:$0xff]  ;;  %vm679_vm1 = vmpackc.low %vm88_vm0, %vm88_vm0  ;;  %590 = vset.pattern.permute.xlu0 %v624_v7  ;;  %591 = vset.pattern.permute.xlu1 %v624_v7 }
   0x2   :  { %v32_v2 = vld [vmem:[%s858_s0] sm:$0xff]  ;;  %v530_v3 = vpack.c.bf16 %v49_v1, %v48_v0  ;;  %v33_v5 = vld [vmem:[%s858_s0 + $0x8] sm:$0xff]  ;;  %v50_v6 = vld [vmem:[%s858_s0 + $0x90] sm:$0xff] }
   0x3   :  { %v533_v8 = vpack.c.bf16 %v33_v5, %v32_v2  ;;  %v51_v9 = vld [vmem:[%s858_s0 + $0x98] sm:$0xff]  ;;  %v34_v11 = vld [vmem:[%s858_s0 + $0x10] sm:$0xff]  ;;  %v52_v13 = vld [vmem:[%s858_s0 + $0xa0] sm:$0xff] }
   0x4   :  { %532 = vmatprep.subr.msk.bf16.mxu0 %vm679_vm1, %v530_v3  ;;  %v536_v10 = vpack.c.bf16 %v51_v9, %v50_v6  ;;  %v35_v12 = vld [vmem:[%s858_s0 + $0x18] sm:$0xff]  ;;  %v53_v14 = vld [vmem:[%s858_s0 + $0xa8] sm:$0xff]  ;;  %v28_v17 = vld [vmem:[%s859_s1] sm:$0xff] }
   0x5   :  { %535 = vmatpush3.bf16.xpose.msk.msra.mxu0 %vm679_vm1, %v533_v8  ;;  %v539_v15 = vpack.c.bf16 %v35_v12, %v34_v11  ;;  %v542_v16 = vpack.c.bf16 %v53_v14, %v52_v13  ;;  %522 = vmatprep.mubr.msk.f32.mxu0 %vm88_vm0, %v28_v17  ;;  %v64_v18 = vld [vmem:[%s860_s2] sm:$0xff]  ;;  %v66_v19 = vld [vmem:[%s860_s2 + $0x10] sm:$0xff]  ;;  %v37_v21 = vld [vmem:[%s858_s0 + $0x28] sm:$0xff] }
   0x6   :  { %538 = vmatprep.subr.msk.bf16.mxu0 %vm679_vm1, %v536_v10  ;;  %v36_v20 = vld [vmem:[%s858_s0 + $0x20] sm:$0xff]  ;;  %v54_v22 = vld [vmem:[%s858_s0 + $0xb0] sm:$0xff]  ;;  %70 = vperm.xlu0 %590, %v64_v18   ;;  %v55_v23 = vld [vmem:[%s858_s0 + $0xb8] sm:$0xff] }
   0x7   :  { %80 = vperm.xlu1 %591, %v66_v19   ;;  %v65_v24 = vld [vmem:[%s860_s2 + $0x8] sm:$0xff] }
   0xd   :  { %541 = vmatpush3.bf16.xpose.msk.msra.mxu0 %vm679_vm1, %v539_v15 }
   0xe   :  { %544 = vmatprep.subr.msk.bf16.mxu0 %vm679_vm1, %v542_v16 }
   0xf   :  { %13 = vsyncpa [#allocation4], 0  ;;  %v67_v25 = vld [vmem:[%s860_s2 + $0x18] sm:$0xff]  ;;  %v545_v26 = vpack.c.bf16 %v37_v21, %v36_v20  ;;  %v548_v27 = vpack.c.bf16 %v55_v23, %v54_v22  ;;  %75 = vperm.xlu0 %590, %v65_v24   ;;  %v295_v28 = vld [vmem:[%s862_s4] sm:$0xff]  ;;  %v625_v60 = vmov 0.0   ;;  %vm301_vm2 = vcmask 261120  }
  0x10   :  { %85 = vperm.xlu1 %591, %v67_v25   ;;  %v378_v29 = vld [vmem:[%s863_s5] sm:$0xff]  ;;  %v38_v30 = vld [vmem:[%s858_s0 + $0x30] sm:$0xff]  ;;  %v39_v31 = vld [vmem:[%s858_s0 + $0x38] sm:$0xff]  ;;  %369 = vmatprep.mubr.f32.mxu1 %v625_v60 }
  0x11   :  { %v56_v32 = vld [vmem:[%s858_s0 + $0xc0] sm:$0xff]  ;;  %v57_v33 = vld [vmem:[%s858_s0 + $0xc8] sm:$0xff]  ;;  %v551_v34 = vpack.c.bf16 %v39_v31, %v38_v30  ;;  %v58_v38 = vld [vmem:[%s858_s0 + $0xd0] sm:$0xff] }
  0x12   :  { %v554_v35 = vpack.c.bf16 %v57_v33, %v56_v32  ;;  %v40_v36 = vld [vmem:[%s858_s0 + $0x40] sm:$0xff]  ;;  %v41_v37 = vld [vmem:[%s858_s0 + $0x48] sm:$0xff]  ;;  %v59_v39 = vld [vmem:[%s858_s0 + $0xd8] sm:$0xff] }
  0x13   :  { %298 = vperm.xlu0 %590, %v295_v28   ;;  %v557_v40 = vpack.c.bf16 %v41_v37, %v40_v36  ;;  %v560_v41 = vpack.c.bf16 %v59_v39, %v58_v38  ;;  %v42_v42 = vld [vmem:[%s858_s0 + $0x50] sm:$0xff]  ;;  %v43_v43 = vld [vmem:[%s858_s0 + $0x58] sm:$0xff]  ;;  %v60_v44 = vld [vmem:[%s858_s0 + $0xe0] sm:$0xff] }
  0x14   :  { %381 = vperm.xlu1 %591, %v378_v29   ;;  %v61_v45 = vld [vmem:[%s858_s0 + $0xe8] sm:$0xff]  ;;  %v563_v46 = vpack.c.bf16 %v43_v43, %v42_v42  ;;  %v44_v48 = vld [vmem:[%s858_s0 + $0x60] sm:$0xff]  ;;  %v62_v50 = vld [vmem:[%s858_s0 + $0xf0] sm:$0xff] }
  0x15   :  { %547 = vmatpush3.bf16.xpose.msk.msra.mxu0 %vm679_vm1, %v545_v26  ;;  %v566_v47 = vpack.c.bf16 %v61_v45, %v60_v44  ;;  %v45_v49 = vld [vmem:[%s858_s0 + $0x68] sm:$0xff]  ;;  %v63_v51 = vld [vmem:[%s858_s0 + $0xf8] sm:$0xff]  ;;  %v46_v54 = vld [vmem:[%s858_s0 + $0x70] sm:$0xff] }
  0x16   :  { %550 = vmatprep.subr.msk.bf16.mxu0 %vm679_vm1, %v548_v27  ;;  %v569_v52 = vpack.c.bf16 %v45_v49, %v44_v48  ;;  %v572_v53 = vpack.c.bf16 %v63_v51, %v62_v50  ;;  %v47_v55 = vld [vmem:[%s858_s0 + $0x78] sm:$0xff]  ;;  %v29_v57 = vld [vmem:[%s859_s1 + $0x8] sm:$0xff]  ;;  %v30_v58 = vld [vmem:[%s859_s1 + $0x10] sm:$0xff]  ;;  %v399_v49 = vstv %s864_s6  ;;  %s627_s6 = smov [#allocation3]  }
  0x17   :  { %v575_v56 = vpack.c.bf16 %v47_v55, %v46_v54  ;;  %v31_v59 = vld [vmem:[%s859_s1 + $0x18] sm:$0xff]  ;;  %v294_v29 = vld [vmem:[%s861_s3] sm:$0xff]  ;;  %s443_s11 = sshll.u32 %s627_s6, 4  ;;  %s444_s11 = int_to_ptr.vmem [resolvable:$true] %s443_s11 }
  0x18   :  { %s600_s12 = scalar_lea.vmem %s444_s11, 32  ;;  %p605_p1 = scmp.lt.s32.totalorder %s444_s11, %s444_s11 }
  0x19   :  { %p601_p0 = scmp.ne.s32.totalorder %s444_s11, %s600_s12  ;;  %p606_p2 = scmp.lt.s32.totalorder %s600_s12, %s600_s12 }
  0x1b   :  { %p607_p3 = por %p606_p2, %p605_p1 }
  0x1d   :  { %553 = vmatpush3.bf16.xpose.msk.msra.mxu0 %vm679_vm1, %v551_v34  ;;  %p608_p4 = pnand %p607_p3, %p601_p0 }
  0x1e   :  { %556 = vmatprep.subr.msk.bf16.mxu0 %vm679_vm1, %v554_v35 }
  0x25   :  { %559 = vmatpush3.bf16.xpose.msk.msra.mxu0 %vm679_vm1, %v557_v40 }
  0x26   :  { %562 = vmatprep.subr.msk.bf16.mxu0 %vm679_vm1, %v560_v41 }
  0x2d   :  { %565 = vmatpush3.bf16.xpose.msk.msra.mxu0 %vm679_vm1, %v563_v46 }
  0x2e   :  { %568 = vmatprep.subr.msk.bf16.mxu0 %vm679_vm1, %v566_v47 }
  0x35   :  { %571 = vmatpush3.bf16.xpose.msk.msra.mxu0 %vm679_vm1, %v569_v52 }
  0x36   :  { %574 = vmatprep.subr.msk.bf16.mxu0 %vm679_vm1, %v572_v53 }
  0x3d   :  { %577 = vmatpush3.bf16.xpose.msk.msra.mxu0 %vm679_vm1, %v575_v56 }
  0x44   :  { %523 = vmatmul.mubr.msk.f32.vlgmr.msra.gmra.mrb[0].mxu0 %vm88_vm0, %v28_v17 }
  0x45   :  { %524 = vmatprep.mubr.msk.f32.mxu0 %vm88_vm0, %v29_v57 }
  0x48   :  { %525 = vmatmul.mubr.msk.f32.gmra.mrb[2].mxu0 %vm88_vm0, %v29_v57 }
  0x49   :  { %526 = vmatprep.mubr.msk.f32.mxu0 %vm88_vm0, %v30_v58 }
  0x4c   :  { %527 = vmatmul.mubr.msk.f32.gmra.mrb[4].mxu0 %vm88_vm0, %v30_v58 }
  0x4d   :  { %528 = vmatprep.mubr.msk.f32.mxu0 %vm88_vm0, %v31_v59 }
  0x50   :  { %529 = vmatmul.mubr.msk.f32.gmra.mrb[6].mxu0 %vm88_vm0, %v31_v59 }
  0x85   :  { %v71_v61 = vpop.permute.xlu0 %70 }
  0x86   :  { %v81_v6 = vpop.permute.xlu1 %80 }
  0x8e   :  { %v76_v1 = vpop.permute.xlu0 %75 }
  0x8f   :  { %v86_v17 = vpop.permute.xlu1 %85 }
  0x92   :  { %v299_v30 = vpop.permute.xlu0 %298 }
  0x93   :  { %v382_v36 = vpop.permute.xlu1 %381 }
 0x117   :  { %v263_v62 = vpop.f32.mrb[0].mxu0 }
 0x118   :  { %v265_v63 = vpop.f32.mrb[1].mxu0  ;;  %v264_v0 = vadd.f32 %v263_v62, %v71_v61 }
 0x119   :  { %v266_v2 = vadd.f32 %v265_v63, %v71_v61  ;;  %v626_v61 = vmov 1966171168   ;;  %v420_v63 = vlaneseq }
 0x11a   :  { %v286_v8 = vmax.f32 %v264_v0, 0.0  ;;  %v418_v62 = vunpack.c.l.s4 %v626_v61 }
 0x11b   :  { %v269_v3 = vpop.f32.mrb[2].mxu0  ;;  %v287_v10 = vmax.f32 %v266_v2, 0.0  ;;  %vm434_vm3 = vcmp.lt.s32.totalorder %v420_v63, 256 }
 0x11c   :  { %v270_v4 = vadd.f32 %v269_v3, %v76_v1  ;;  %v271_v5 = vpop.f32.mrb[3].mxu0  ;;  %v419_v0 = vunpack.c.0.s8 %v418_v62 }
 0x11d   :  { %v272_v7 = vadd.f32 %v271_v5, %v76_v1  ;;  %v421_v1 = vshrl.u32 %v420_v63, 7 }
 0x11e   :  { %v288_v9 = vmax.f32 %v270_v4, 0.0 }
 0x11f   :  { %v289_v11 = vmax.f32 %v272_v7, 0.0  ;;  %v275_v12 = vpop.f32.mrb[4].mxu0  ;;  %v422_v3 = vsub.s32 %v419_v0, %v421_v1 }
 0x120   :  { %v277_v13 = vpop.f32.mrb[5].mxu0  ;;  %v580_v14 = vpack.c.bf16 %v288_v9, %v286_v8  ;;  %v276_v16 = vadd.f32 %v275_v12, %v81_v6 }
 0x121   :  { %v578_v15 = vpack.c.bf16 %v289_v11, %v287_v10  ;;  %v278_v18 = vadd.f32 %v277_v13, %v81_v6 }
 0x122   :  { %v290_v23 = vmax.f32 %v276_v16, 0.0 }
 0x123   :  { %v281_v19 = vpop.f32.mrb[6].mxu0  ;;  %579 = vmatprep.subr.bf16.mxu1 %v578_v15  ;;  %v291_v25 = vmax.f32 %v278_v18, 0.0 }
 0x124   :  { %v282_v20 = vadd.f32 %v281_v19, %v86_v17  ;;  %v283_v21 = vpop.f32.mrb[7].mxu0  ;;  %581 = vmatpush1.bf16.msra.mxu1 %v580_v14 }
 0x125   :  { %v284_v22 = vadd.f32 %v283_v21, %v86_v17 }
 0x126   :  { %v292_v24 = vmax.f32 %v282_v20, 0.0 }
 0x127   :  { %v293_v26 = vmax.f32 %v284_v22, 0.0 }
 0x128   :  { %v584_v27 = vpack.c.bf16 %v292_v24, %v290_v23 }
 0x129   :  { %v582_v28 = vpack.c.bf16 %v293_v26, %v291_v25 }
 0x12b   :  { %583 = vmatprep.subr.bf16.mxu1 %v582_v28 }
 0x12c   :  { %585 = vmatpush1.bf16.msra.mxu1 %v584_v27 }
 0x12f   :  { %487 = vmatmul.mubr.msk.f32.vlgmr.msra.gmra.mrb[0].mxu1 %vm301_vm2, %v294_v29 }
 0x202   :  { %v371_v31 = vpop.f32.mrb[0].mxu1 }
 0x203   :  { %v372_v32 = vadd.f32 %v371_v31, %v299_v30  ;;  %v373_v33 = vpop.f32.mrb[1].mxu1 }
 0x204   :  { %v374_v34 = vadd.f32 %v373_v33, %v299_v30 }
 0x205   :  { %v376_v35 = vmax.f32 %v372_v32, 0.0 }
 0x206   :  { %v377_v37 = vmax.f32 %v374_v34, 0.0 }
 0x207   :  { %v384_v38 = vmul.f32 %v382_v36, %v376_v35 }
 0x208   :  { %v385_v39 = vmul.f32 %v382_v36, %v377_v37 }
 0x209   :  { %v386_v40 = vrot.slane %v384_v38, 4 }
 0x20a   :  { %v392_v41 = vrot.slane %v385_v39, 4 }
 0x20b   :  { %v387_v42 = vadd.f32 %v386_v40, %v384_v38 }
 0x20c   :  { %v393_v43 = vadd.f32 %v392_v41, %v385_v39 }
 0x20d   :  { %v388_v44 = vrot.slane %v387_v42, 2 }
 0x20e   :  { %v394_v45 = vrot.slane %v393_v43, 2 }
 0x20f   :  { %v389_v46 = vadd.f32 %v388_v44, %v387_v42 }
 0x210   :  { %v395_v47 = vadd.f32 %v394_v45, %v393_v43 }
 0x211   :  { %v390_v48 = vrot.slane %v389_v46, 1 }
 0x212   :  { %v396_v50 = vrot.slane %v395_v47, 1 }
 0x213   :  { %v391_v51 = vadd.f32 %v390_v48, %v389_v46 }
 0x214   :  { %v397_v52 = vadd.f32 %v396_v50, %v395_v47 }
 0x215   :  { %v400_v53 = vadd.f32 %v399_v49, %v391_v51 }
 0x216   :  { %v401_v54 = vadd.f32 %v399_v49, %v397_v52 }
 0x217   :  { %v488_v55 = vmul.f32 -1.442695, %v400_v53 }
 0x218   :  { %v489_v56 = vmul.f32 -1.442695, %v401_v54 }
 0x219   :  { %592 = vpow2.f32 %v488_v55 }
 0x21a   :  { %594 = vpow2.f32 %v489_v56 }
 0x223   :  { %v593_v57 = vpop.eup %592 }
 0x224   :  { %v595_v58 = vpop.eup %594  ;;  %v408_v59 = vadd.f32 1.0, %v593_v57 }
 0x225   :  { %v409_v60 = vadd.f32 1.0, %v595_v58 }
 0x226   :  { %596 = vrcp.f32 %v408_v59 }
 0x227   :  { %598 = vrcp.f32 %v409_v60 }
 0x230   :  { %v597_v2 = vpop.eup %596 }
 0x231   :  { %v599_v4 = vpop.eup %598 }
 0x232   :  { %v416_v5 = vcombine.low %v597_v2, %v599_v4 }
 0x234   :  { %v423_v6 = vrot.slane %v416_v5, %v422_v3 }
 0x236   :  { %v430_v7 = vrot.slane %v423_v6, %v422_v3 }
 0x238   :  { %436 = vst.msk [vmem:[#allocation3] sm:$0x3] %vm434_vm3, %v430_v7 }
 0x239   :  { %611 = shalt.err (!%p608_p4)
}
 0x23a   :  { %s612_s15 = scalar_lea.hbm %s865_s7, 32 }
 0x23b   :  { %p613_p5 = scmp.ne.s32.totalorder %s865_s7, %s612_s15  ;;  %p616_p6 = scmp.lt.u32.totalorder %s612_s15, %s865_s7 }
 0x23d   :  { %p618_p7 = pnand %p616_p6, %p613_p5 }
 0x23f   :  { %621 = shalt.err (!%p618_p7)
}
 0x240   :  { %446 = dma.vmem_to_hbm [thread:$0]  %s444_s11, 32, %s865_s7, [#allocation4]  }
 0x241   :  { %622 = dma.done.wait [#allocation4], 32  }
 0x242   :  { %623 = vsyncadd [#allocation4], 4294967264 }
 0x243   :  { %450 = vsyncpa [#allocation4], 1 }

</bundles_post_ra>
